<compile_context>
chip_gen: v5e
topology: v5e:2x2
jax: 0.10.0
libtpu: 0.0.40
codegen_flags: <defaults>
</compile_context>

<pallas_src>
import functools

import jax
import jax.numpy as jnp
from jax import lax
from jax.experimental import pallas as pl
from jax.experimental.pallas import tpu as pltpu


def _lstm_head_kernel(ids_ref,      # [T*Bp, 1] int32  time-major flattened token ids
                      table_ref,    # [Vp, E]   bf16   embedding table (vocab padded to 128)
                      wih_f_ref,    # [E, 4H]   bf16   forward dir input weights (pre-transposed)
                      whh_f_ref,    # [H, 4H]   bf16   forward dir recurrent weights
                      b_f_ref,      # [1, 4H]   f32    b_ih + b_hh (forward)
                      wih_b_ref,    # [E, 4H]   bf16   reverse dir input weights
                      b_b_ref,      # [1, 4H]   f32    b_ih + b_hh (reverse)
                      fcw_f_ref,    # [H, C]    f32    fc weight acting on forward half
                      fcw_b_ref,    # [H, C]    f32    fc weight acting on reverse half
                      fcb_ref,      # [1, C]    f32
                      gamma_ref,    # [1, C]    f32    LayerNorm weight
                      beta_ref,     # [1, C]    f32    LayerNorm bias
                      out_ref,      # [Bp, C]   f32    post-LayerNorm logits
                      *, T, B, H, V):
    TB = T * B

    # ---- embedding gather as a one-hot MXU matmul (fused; no HBM roundtrip of x) ----
    lane_iota = lax.broadcasted_iota(jnp.int32, (TB, V), 1)
    one_hot = (ids_ref[...] == lane_iota).astype(jnp.bfloat16)        # [TB, Vp]
    x = jnp.dot(one_hot, table_ref[...],
                preferred_element_type=jnp.float32).astype(jnp.bfloat16)  # [TB, E]

    # ---- hoisted forward input projection: ONE big MXU push, bias folded in ----
    gates_in_f = (jnp.dot(x, wih_f_ref[...], preferred_element_type=jnp.float32)
                  + b_f_ref[...])                                      # [TB, 4H] f32

    whh_f = whh_f_ref[...]                                             # keep resident

    h = jnp.zeros((B, H), jnp.float32)
    c = jnp.zeros((B, H), jnp.float32)

    # ---- fully unrolled forward recurrence (T static & small) ----
    for t in range(T):
        g_in = gates_in_f[t * B:(t + 1) * B, :]                        # static sublane-aligned slice
        gates = g_in + jnp.dot(h.astype(jnp.bfloat16), whh_f,
                               preferred_element_type=jnp.float32)     # [Bp, 4H]
        # PyTorch gate order: i, f, g, o.  One sigmoid over the whole gate vreg,
        # tanh only on the g slice.
        sig = jax.nn.sigmoid(gates)
        i = sig[:, 0 * H:1 * H]
        f = sig[:, 1 * H:2 * H]
        o = sig[:, 3 * H:4 * H]
        g = jnp.tanh(gates[:, 2 * H:3 * H])
        c = f * c + i * g
        h = o * jnp.tanh(c)
    h_fwd = h                                                          # [Bp, H]

    # ---- reverse direction: single step on x[T-1] from the zero state ----
    # (h0 @ W_hh_reverse and f*c0 terms are exactly zero and are dropped)
    x_last = x[(T - 1) * B:T * B, :]                                   # [Bp, E] bf16
    gates_b = (jnp.dot(x_last, wih_b_ref[...], preferred_element_type=jnp.float32)
               + b_b_ref[...])                                         # [Bp, 4H]
    sig_b = jax.nn.sigmoid(gates_b)
    i_b = sig_b[:, 0 * H:1 * H]
    o_b = sig_b[:, 3 * H:4 * H]
    g_b = jnp.tanh(gates_b[:, 2 * H:3 * H])
    h_bwd = o_b * jnp.tanh(i_b * g_b)                                  # [Bp, H]

    # ---- fc on the split halves (no lane-domain concat) ----
    logits = (jnp.dot(h_fwd, fcw_f_ref[...], preferred_element_type=jnp.float32)
              + jnp.dot(h_bwd, fcw_b_ref[...], preferred_element_type=jnp.float32)
              + fcb_ref[...])                                          # [Bp, C]

    # ---- LayerNorm (eps = 1e-5, nn.LayerNorm default) ----
    mean = jnp.mean(logits, axis=-1, keepdims=True)
    var = jnp.mean((logits - mean) ** 2, axis=-1, keepdims=True)
    normed = (logits - mean) * lax.rsqrt(var + 1e-5)
    out_ref[...] = normed * gamma_ref[...] + beta_ref[...]


def lstm_model_forward(word_ids, params):
    """word_ids: [B, T] int32. Returns (loss=None, predictions[B] int32, logits[B, C])."""
    embed_table = params["embed"]                     # [V, E]
    V, E = embed_table.shape
    B, T = word_ids.shape
    H = E                                             # hidden_size == embed_dim in this model
    C = params["fc_b"].shape[0]

    # Pad batch to the 8-sublane granule; pad vocab to the 128-lane granule for the one-hot.
    Bp = max(8, ((B + 7) // 8) * 8)
    Vp = ((V + 127) // 128) * 128

    # Time-major flattened ids (row = t*Bp + b). Padded batch rows use token 0; they are
    # independent of real rows and are sliced off after the kernel.
    ids_tm = jnp.pad(word_ids.T.astype(jnp.int32), ((0, 0), (0, Bp - B)))
    ids_col = ids_tm.reshape(T * Bp, 1)

    table = jnp.pad(embed_table, ((0, Vp - V), (0, 0))).astype(jnp.bfloat16)

    fc_w_t = params["fc_w"].T                         # [2H, C]
    kernel_inputs = (
        ids_col,                                                       # [T*Bp, 1] int32
        table,                                                         # [Vp, E]   bf16
        params["w_ih_f"].T.astype(jnp.bfloat16),                       # [E, 4H]
        params["w_hh_f"].T.astype(jnp.bfloat16),                       # [H, 4H]
        (params["b_ih_f"] + params["b_hh_f"])[None, :].astype(jnp.float32),
        params["w_ih_b"].T.astype(jnp.bfloat16),                       # [E, 4H]
        (params["b_ih_b"] + params["b_hh_b"])[None, :].astype(jnp.float32),
        fc_w_t[:H, :].astype(jnp.float32),                             # fc weight, forward half
        fc_w_t[H:, :].astype(jnp.float32),                             # fc weight, reverse half
        params["fc_b"][None, :].astype(jnp.float32),
        params["ln_gamma"][None, :].astype(jnp.float32),
        params["ln_beta"][None, :].astype(jnp.float32),
    )

    vmem_spec = pl.BlockSpec(memory_space=pltpu.MemorySpace.VMEM)
    logits_padded = pl.pallas_call(
        functools.partial(_lstm_head_kernel, T=T, B=Bp, H=H, V=Vp),
        out_shape=jax.ShapeDtypeStruct((Bp, C), jnp.float32),
        in_specs=[vmem_spec] * len(kernel_inputs),
        out_specs=vmem_spec,
    )(*kernel_inputs)

    logits = logits_padded[:B]
    preds = jnp.argmax(logits, axis=-1)
    # TODO(synk): CrossEntropyLoss branch not exercised (label_ids=None path of the module).
    return None, preds, logits


def init_params(key, vocab_len, embed_dim, num_classes):
    H = embed_dim
    ks = jax.random.split(key, 10)
    scale = 0.1
    return {
        "embed":   scale * jax.random.normal(ks[0], (vocab_len, embed_dim), jnp.float32),
        "w_ih_f":  scale * jax.random.normal(ks[1], (4 * H, embed_dim), jnp.float32),
        "w_hh_f":  scale * jax.random.normal(ks[2], (4 * H, H), jnp.float32),
        "b_ih_f":  scale * jax.random.normal(ks[3], (4 * H,), jnp.float32),
        "b_hh_f":  scale * jax.random.normal(ks[4], (4 * H,), jnp.float32),
        "w_ih_b":  scale * jax.random.normal(ks[5], (4 * H, embed_dim), jnp.float32),
        "w_hh_b":  scale * jax.random.normal(ks[6], (4 * H, H), jnp.float32),  # unused for x[-1] output
        "b_ih_b":  scale * jax.random.normal(ks[7], (4 * H,), jnp.float32),
        "b_hh_b":  scale * jax.random.normal(ks[8], (4 * H,), jnp.float32),
        "fc_w":    scale * jax.random.normal(ks[9], (num_classes, 2 * H), jnp.float32),
        "fc_b":    jnp.zeros((num_classes,), jnp.float32),
        "ln_gamma": jnp.ones((num_classes,), jnp.float32),   # nn.LayerNorm default init
        "ln_beta":  jnp.zeros((num_classes,), jnp.float32),
    }


if __name__ == "__main__":
    VOCAB = 100
    EMBED_DIM = 32          # hidden size == embed_dim in the module
    NUM_CLASSES = 8
    BATCH = 2
    SEQ = 8

    key = jax.random.PRNGKey(0)
    k_param, k_ids = jax.random.split(key)
    params = init_params(k_param, VOCAB, EMBED_DIM, NUM_CLASSES)
    word_ids = jax.random.randint(k_ids, (BATCH, SEQ), 0, VOCAB, dtype=jnp.int32)

    forward = jax.jit(lstm_model_forward)
    loss, preds, logits = forward(word_ids, params)
    jax.block_until_ready(preds)
    jax.block_until_ready(logits)
    assert preds.shape == (BATCH,)
    assert logits.shape == (BATCH, NUM_CLASSES)
    print("KERNEL_OK")
</pallas_src>

<mosaic_0001>
module attributes {stable_mosaic.version = 11 : i64} {
  func.func @_lstm_head_kernel(%arg0: memref<64x1xi32, #tpu.memory_space<vmem>>, %arg1: memref<128x32xbf16, #tpu.memory_space<vmem>>, %arg2: memref<32x128xbf16, #tpu.memory_space<vmem>>, %arg3: memref<32x128xbf16, #tpu.memory_space<vmem>>, %arg4: memref<1x128xf32, #tpu.memory_space<vmem>>, %arg5: memref<32x128xbf16, #tpu.memory_space<vmem>>, %arg6: memref<1x128xf32, #tpu.memory_space<vmem>>, %arg7: memref<32x8xf32, #tpu.memory_space<vmem>>, %arg8: memref<32x8xf32, #tpu.memory_space<vmem>>, %arg9: memref<1x8xf32, #tpu.memory_space<vmem>>, %arg10: memref<1x8xf32, #tpu.memory_space<vmem>>, %arg11: memref<1x8xf32, #tpu.memory_space<vmem>>, %arg12: memref<8x8xf32, #tpu.memory_space<vmem>>) attributes {dimension_semantics = [], scalar_prefetch = 0 : i64, scratch_operands = 0 : i64, tpu.core_type = #tpu.core_type<tc>} {
    %0 = tpu.iota {dimensions = array<i32: 1>} : vector<64x128xi32>
    %c0 = arith.constant 0 : index
    %c0_0 = arith.constant 0 : index
    %1 = vector.load %arg0[%c0, %c0_0] : memref<64x1xi32, #tpu.memory_space<vmem>>, vector<64x1xi32>
    %2 = vector.broadcast %1 : vector<64x1xi32> to vector<64x128xi32>
    %3 = arith.cmpi eq, %2, %0 : vector<64x128xi32>
    %4 = arith.extui %3 : vector<64x128xi1> to vector<64x128xi32>
    %5 = arith.sitofp %4 : vector<64x128xi32> to vector<64x128xf32>
    %6 = arith.truncf %5 : vector<64x128xf32> to vector<64x128xbf16>
    %c0_1 = arith.constant 0 : index
    %c0_2 = arith.constant 0 : index
    %7 = vector.load %arg1[%c0_1, %c0_2] : memref<128x32xbf16, #tpu.memory_space<vmem>>, vector<128x32xbf16>
    %cst = arith.constant dense<0.000000e+00> : vector<64x32xf32>
    %8 = tpu.matmul %6, %7, %cst {dimension_numbers = #tpu.dot_dimension_numbers<[1], [0], [0], [1], [0, 0, 1, 1], [], []>} : vector<64x128xbf16>, vector<128x32xbf16>, vector<64x32xf32> -> vector<64x32xf32>
    %9 = arith.truncf %8 : vector<64x32xf32> to vector<64x32xbf16>
    %c0_3 = arith.constant 0 : index
    %c0_4 = arith.constant 0 : index
    %10 = vector.load %arg2[%c0_3, %c0_4] : memref<32x128xbf16, #tpu.memory_space<vmem>>, vector<32x128xbf16>
    %cst_5 = arith.constant dense<0.000000e+00> : vector<64x128xf32>
    %11 = tpu.matmul %9, %10, %cst_5 {dimension_numbers = #tpu.dot_dimension_numbers<[1], [0], [0], [1], [0, 0, 1, 1], [], []>} : vector<64x32xbf16>, vector<32x128xbf16>, vector<64x128xf32> -> vector<64x128xf32>
    %c0_6 = arith.constant 0 : index
    %c0_7 = arith.constant 0 : index
    %12 = vector.load %arg4[%c0_6, %c0_7] : memref<1x128xf32, #tpu.memory_space<vmem>>, vector<1x128xf32>
    %13 = vector.broadcast %12 : vector<1x128xf32> to vector<64x128xf32>
    %14 = arith.addf %11, %13 : vector<64x128xf32>
    %c0_8 = arith.constant 0 : index
    %c0_9 = arith.constant 0 : index
    %15 = vector.load %arg3[%c0_8, %c0_9] : memref<32x128xbf16, #tpu.memory_space<vmem>>, vector<32x128xbf16>
    %cst_10 = arith.constant 0.000000e+00 : f32
    %16 = vector.broadcast %cst_10 : f32 to vector<8x32xf32>
    %cst_11 = arith.constant 0.000000e+00 : f32
    %17 = vector.broadcast %cst_11 : f32 to vector<8x32xf32>
    %18 = vector.extract_strided_slice %14 {offsets = [0, 0], sizes = [8, 128], strides = [1, 1]} : vector<64x128xf32> to vector<8x128xf32>
    %19 = arith.truncf %16 : vector<8x32xf32> to vector<8x32xbf16>
    %cst_12 = arith.constant dense<0.000000e+00> : vector<8x128xf32>
    %20 = tpu.matmul %19, %15, %cst_12 {dimension_numbers = #tpu.dot_dimension_numbers<[1], [0], [0], [1], [0, 0, 1, 1], [], []>} : vector<8x32xbf16>, vector<32x128xbf16>, vector<8x128xf32> -> vector<8x128xf32>
    %21 = arith.addf %18, %20 : vector<8x128xf32>
    %22 = arith.negf %21 : vector<8x128xf32>
    %23 = math.exp %22 : vector<8x128xf32>
    %cst_13 = arith.constant 1.000000e+00 : f32
    %24 = vector.broadcast %cst_13 : f32 to vector<8x128xf32>
    %25 = arith.addf %24, %23 : vector<8x128xf32>
    %26 = arith.divf %24, %25 : vector<8x128xf32>
    %27 = vector.extract_strided_slice %26 {offsets = [0, 0], sizes = [8, 32], strides = [1, 1]} : vector<8x128xf32> to vector<8x32xf32>
    %28 = vector.extract_strided_slice %26 {offsets = [0, 32], sizes = [8, 32], strides = [1, 1]} : vector<8x128xf32> to vector<8x32xf32>
    %29 = vector.extract_strided_slice %26 {offsets = [0, 96], sizes = [8, 32], strides = [1, 1]} : vector<8x128xf32> to vector<8x32xf32>
    %30 = vector.extract_strided_slice %21 {offsets = [0, 64], sizes = [8, 32], strides = [1, 1]} : vector<8x128xf32> to vector<8x32xf32>
    %31 = math.tanh %30 : vector<8x32xf32>
    %32 = arith.mulf %28, %17 : vector<8x32xf32>
    %33 = arith.mulf %27, %31 : vector<8x32xf32>
    %34 = arith.addf %32, %33 : vector<8x32xf32>
    %35 = math.tanh %34 : vector<8x32xf32>
    %36 = arith.mulf %29, %35 : vector<8x32xf32>
    %37 = vector.extract_strided_slice %14 {offsets = [8, 0], sizes = [8, 128], strides = [1, 1]} : vector<64x128xf32> to vector<8x128xf32>
    %38 = arith.truncf %36 : vector<8x32xf32> to vector<8x32xbf16>
    %cst_14 = arith.constant dense<0.000000e+00> : vector<8x128xf32>
    %39 = tpu.matmul %38, %15, %cst_14 {dimension_numbers = #tpu.dot_dimension_numbers<[1], [0], [0], [1], [0, 0, 1, 1], [], []>} : vector<8x32xbf16>, vector<32x128xbf16>, vector<8x128xf32> -> vector<8x128xf32>
    %40 = arith.addf %37, %39 : vector<8x128xf32>
    %41 = arith.negf %40 : vector<8x128xf32>
    %42 = math.exp %41 : vector<8x128xf32>
    %cst_15 = arith.constant 1.000000e+00 : f32
    %43 = vector.broadcast %cst_15 : f32 to vector<8x128xf32>
    %44 = arith.addf %43, %42 : vector<8x128xf32>
    %45 = arith.divf %43, %44 : vector<8x128xf32>
    %46 = vector.extract_strided_slice %45 {offsets = [0, 0], sizes = [8, 32], strides = [1, 1]} : vector<8x128xf32> to vector<8x32xf32>
    %47 = vector.extract_strided_slice %45 {offsets = [0, 32], sizes = [8, 32], strides = [1, 1]} : vector<8x128xf32> to vector<8x32xf32>
    %48 = vector.extract_strided_slice %45 {offsets = [0, 96], sizes = [8, 32], strides = [1, 1]} : vector<8x128xf32> to vector<8x32xf32>
    %49 = vector.extract_strided_slice %40 {offsets = [0, 64], sizes = [8, 32], strides = [1, 1]} : vector<8x128xf32> to vector<8x32xf32>
    %50 = math.tanh %49 : vector<8x32xf32>
    %51 = arith.mulf %47, %34 : vector<8x32xf32>
    %52 = arith.mulf %46, %50 : vector<8x32xf32>
    %53 = arith.addf %51, %52 : vector<8x32xf32>
    %54 = math.tanh %53 : vector<8x32xf32>
    %55 = arith.mulf %48, %54 : vector<8x32xf32>
    %56 = vector.extract_strided_slice %14 {offsets = [16, 0], sizes = [8, 128], strides = [1, 1]} : vector<64x128xf32> to vector<8x128xf32>
    %57 = arith.truncf %55 : vector<8x32xf32> to vector<8x32xbf16>
    %cst_16 = arith.constant dense<0.000000e+00> : vector<8x128xf32>
    %58 = tpu.matmul %57, %15, %cst_16 {dimension_numbers = #tpu.dot_dimension_numbers<[1], [0], [0], [1], [0, 0, 1, 1], [], []>} : vector<8x32xbf16>, vector<32x128xbf16>, vector<8x128xf32> -> vector<8x128xf32>
    %59 = arith.addf %56, %58 : vector<8x128xf32>
    %60 = arith.negf %59 : vector<8x128xf32>
    %61 = math.exp %60 : vector<8x128xf32>
    %cst_17 = arith.constant 1.000000e+00 : f32
    %62 = vector.broadcast %cst_17 : f32 to vector<8x128xf32>
    %63 = arith.addf %62, %61 : vector<8x128xf32>
    %64 = arith.divf %62, %63 : vector<8x128xf32>
    %65 = vector.extract_strided_slice %64 {offsets = [0, 0], sizes = [8, 32], strides = [1, 1]} : vector<8x128xf32> to vector<8x32xf32>
    %66 = vector.extract_strided_slice %64 {offsets = [0, 32], sizes = [8, 32], strides = [1, 1]} : vector<8x128xf32> to vector<8x32xf32>
    %67 = vector.extract_strided_slice %64 {offsets = [0, 96], sizes = [8, 32], strides = [1, 1]} : vector<8x128xf32> to vector<8x32xf32>
    %68 = vector.extract_strided_slice %59 {offsets = [0, 64], sizes = [8, 32], strides = [1, 1]} : vector<8x128xf32> to vector<8x32xf32>
    %69 = math.tanh %68 : vector<8x32xf32>
    %70 = arith.mulf %66, %53 : vector<8x32xf32>
    %71 = arith.mulf %65, %69 : vector<8x32xf32>
    %72 = arith.addf %70, %71 : vector<8x32xf32>
    %73 = math.tanh %72 : vector<8x32xf32>
    %74 = arith.mulf %67, %73 : vector<8x32xf32>
    %75 = vector.extract_strided_slice %14 {offsets = [24, 0], sizes = [8, 128], strides = [1, 1]} : vector<64x128xf32> to vector<8x128xf32>
    %76 = arith.truncf %74 : vector<8x32xf32> to vector<8x32xbf16>
    %cst_18 = arith.constant dense<0.000000e+00> : vector<8x128xf32>
    %77 = tpu.matmul %76, %15, %cst_18 {dimension_numbers = #tpu.dot_dimension_numbers<[1], [0], [0], [1], [0, 0, 1, 1], [], []>} : vector<8x32xbf16>, vector<32x128xbf16>, vector<8x128xf32> -> vector<8x128xf32>
    %78 = arith.addf %75, %77 : vector<8x128xf32>
    %79 = arith.negf %78 : vector<8x128xf32>
    %80 = math.exp %79 : vector<8x128xf32>
    %cst_19 = arith.constant 1.000000e+00 : f32
    %81 = vector.broadcast %cst_19 : f32 to vector<8x128xf32>
    %82 = arith.addf %81, %80 : vector<8x128xf32>
    %83 = arith.divf %81, %82 : vector<8x128xf32>
    %84 = vector.extract_strided_slice %83 {offsets = [0, 0], sizes = [8, 32], strides = [1, 1]} : vector<8x128xf32> to vector<8x32xf32>
    %85 = vector.extract_strided_slice %83 {offsets = [0, 32], sizes = [8, 32], strides = [1, 1]} : vector<8x128xf32> to vector<8x32xf32>
    %86 = vector.extract_strided_slice %83 {offsets = [0, 96], sizes = [8, 32], strides = [1, 1]} : vector<8x128xf32> to vector<8x32xf32>
    %87 = vector.extract_strided_slice %78 {offsets = [0, 64], sizes = [8, 32], strides = [1, 1]} : vector<8x128xf32> to vector<8x32xf32>
    %88 = math.tanh %87 : vector<8x32xf32>
    %89 = arith.mulf %85, %72 : vector<8x32xf32>
    %90 = arith.mulf %84, %88 : vector<8x32xf32>
    %91 = arith.addf %89, %90 : vector<8x32xf32>
    %92 = math.tanh %91 : vector<8x32xf32>
    %93 = arith.mulf %86, %92 : vector<8x32xf32>
    %94 = vector.extract_strided_slice %14 {offsets = [32, 0], sizes = [8, 128], strides = [1, 1]} : vector<64x128xf32> to vector<8x128xf32>
    %95 = arith.truncf %93 : vector<8x32xf32> to vector<8x32xbf16>
    %cst_20 = arith.constant dense<0.000000e+00> : vector<8x128xf32>
    %96 = tpu.matmul %95, %15, %cst_20 {dimension_numbers = #tpu.dot_dimension_numbers<[1], [0], [0], [1], [0, 0, 1, 1], [], []>} : vector<8x32xbf16>, vector<32x128xbf16>, vector<8x128xf32> -> vector<8x128xf32>
    %97 = arith.addf %94, %96 : vector<8x128xf32>
    %98 = arith.negf %97 : vector<8x128xf32>
    %99 = math.exp %98 : vector<8x128xf32>
    %cst_21 = arith.constant 1.000000e+00 : f32
    %100 = vector.broadcast %cst_21 : f32 to vector<8x128xf32>
    %101 = arith.addf %100, %99 : vector<8x128xf32>
    %102 = arith.divf %100, %101 : vector<8x128xf32>
    %103 = vector.extract_strided_slice %102 {offsets = [0, 0], sizes = [8, 32], strides = [1, 1]} : vector<8x128xf32> to vector<8x32xf32>
    %104 = vector.extract_strided_slice %102 {offsets = [0, 32], sizes = [8, 32], strides = [1, 1]} : vector<8x128xf32> to vector<8x32xf32>
    %105 = vector.extract_strided_slice %102 {offsets = [0, 96], sizes = [8, 32], strides = [1, 1]} : vector<8x128xf32> to vector<8x32xf32>
    %106 = vector.extract_strided_slice %97 {offsets = [0, 64], sizes = [8, 32], strides = [1, 1]} : vector<8x128xf32> to vector<8x32xf32>
    %107 = math.tanh %106 : vector<8x32xf32>
    %108 = arith.mulf %104, %91 : vector<8x32xf32>
    %109 = arith.mulf %103, %107 : vector<8x32xf32>
    %110 = arith.addf %108, %109 : vector<8x32xf32>
    %111 = math.tanh %110 : vector<8x32xf32>
    %112 = arith.mulf %105, %111 : vector<8x32xf32>
    %113 = vector.extract_strided_slice %14 {offsets = [40, 0], sizes = [8, 128], strides = [1, 1]} : vector<64x128xf32> to vector<8x128xf32>
    %114 = arith.truncf %112 : vector<8x32xf32> to vector<8x32xbf16>
    %cst_22 = arith.constant dense<0.000000e+00> : vector<8x128xf32>
    %115 = tpu.matmul %114, %15, %cst_22 {dimension_numbers = #tpu.dot_dimension_numbers<[1], [0], [0], [1], [0, 0, 1, 1], [], []>} : vector<8x32xbf16>, vector<32x128xbf16>, vector<8x128xf32> -> vector<8x128xf32>
    %116 = arith.addf %113, %115 : vector<8x128xf32>
    %117 = arith.negf %116 : vector<8x128xf32>
    %118 = math.exp %117 : vector<8x128xf32>
    %cst_23 = arith.constant 1.000000e+00 : f32
    %119 = vector.broadcast %cst_23 : f32 to vector<8x128xf32>
    %120 = arith.addf %119, %118 : vector<8x128xf32>
    %121 = arith.divf %119, %120 : vector<8x128xf32>
    %122 = vector.extract_strided_slice %121 {offsets = [0, 0], sizes = [8, 32], strides = [1, 1]} : vector<8x128xf32> to vector<8x32xf32>
    %123 = vector.extract_strided_slice %121 {offsets = [0, 32], sizes = [8, 32], strides = [1, 1]} : vector<8x128xf32> to vector<8x32xf32>
    %124 = vector.extract_strided_slice %121 {offsets = [0, 96], sizes = [8, 32], strides = [1, 1]} : vector<8x128xf32> to vector<8x32xf32>
    %125 = vector.extract_strided_slice %116 {offsets = [0, 64], sizes = [8, 32], strides = [1, 1]} : vector<8x128xf32> to vector<8x32xf32>
    %126 = math.tanh %125 : vector<8x32xf32>
    %127 = arith.mulf %123, %110 : vector<8x32xf32>
    %128 = arith.mulf %122, %126 : vector<8x32xf32>
    %129 = arith.addf %127, %128 : vector<8x32xf32>
    %130 = math.tanh %129 : vector<8x32xf32>
    %131 = arith.mulf %124, %130 : vector<8x32xf32>
    %132 = vector.extract_strided_slice %14 {offsets = [48, 0], sizes = [8, 128], strides = [1, 1]} : vector<64x128xf32> to vector<8x128xf32>
    %133 = arith.truncf %131 : vector<8x32xf32> to vector<8x32xbf16>
    %cst_24 = arith.constant dense<0.000000e+00> : vector<8x128xf32>
    %134 = tpu.matmul %133, %15, %cst_24 {dimension_numbers = #tpu.dot_dimension_numbers<[1], [0], [0], [1], [0, 0, 1, 1], [], []>} : vector<8x32xbf16>, vector<32x128xbf16>, vector<8x128xf32> -> vector<8x128xf32>
    %135 = arith.addf %132, %134 : vector<8x128xf32>
    %136 = arith.negf %135 : vector<8x128xf32>
    %137 = math.exp %136 : vector<8x128xf32>
    %cst_25 = arith.constant 1.000000e+00 : f32
    %138 = vector.broadcast %cst_25 : f32 to vector<8x128xf32>
    %139 = arith.addf %138, %137 : vector<8x128xf32>
    %140 = arith.divf %138, %139 : vector<8x128xf32>
    %141 = vector.extract_strided_slice %140 {offsets = [0, 0], sizes = [8, 32], strides = [1, 1]} : vector<8x128xf32> to vector<8x32xf32>
    %142 = vector.extract_strided_slice %140 {offsets = [0, 32], sizes = [8, 32], strides = [1, 1]} : vector<8x128xf32> to vector<8x32xf32>
    %143 = vector.extract_strided_slice %140 {offsets = [0, 96], sizes = [8, 32], strides = [1, 1]} : vector<8x128xf32> to vector<8x32xf32>
    %144 = vector.extract_strided_slice %135 {offsets = [0, 64], sizes = [8, 32], strides = [1, 1]} : vector<8x128xf32> to vector<8x32xf32>
    %145 = math.tanh %144 : vector<8x32xf32>
    %146 = arith.mulf %142, %129 : vector<8x32xf32>
    %147 = arith.mulf %141, %145 : vector<8x32xf32>
    %148 = arith.addf %146, %147 : vector<8x32xf32>
    %149 = math.tanh %148 : vector<8x32xf32>
    %150 = arith.mulf %143, %149 : vector<8x32xf32>
    %151 = vector.extract_strided_slice %14 {offsets = [56, 0], sizes = [8, 128], strides = [1, 1]} : vector<64x128xf32> to vector<8x128xf32>
    %152 = arith.truncf %150 : vector<8x32xf32> to vector<8x32xbf16>
    %cst_26 = arith.constant dense<0.000000e+00> : vector<8x128xf32>
    %153 = tpu.matmul %152, %15, %cst_26 {dimension_numbers = #tpu.dot_dimension_numbers<[1], [0], [0], [1], [0, 0, 1, 1], [], []>} : vector<8x32xbf16>, vector<32x128xbf16>, vector<8x128xf32> -> vector<8x128xf32>
    %154 = arith.addf %151, %153 : vector<8x128xf32>
    %155 = arith.negf %154 : vector<8x128xf32>
    %156 = math.exp %155 : vector<8x128xf32>
    %cst_27 = arith.constant 1.000000e+00 : f32
    %157 = vector.broadcast %cst_27 : f32 to vector<8x128xf32>
    %158 = arith.addf %157, %156 : vector<8x128xf32>
    %159 = arith.divf %157, %158 : vector<8x128xf32>
    %160 = vector.extract_strided_slice %159 {offsets = [0, 0], sizes = [8, 32], strides = [1, 1]} : vector<8x128xf32> to vector<8x32xf32>
    %161 = vector.extract_strided_slice %159 {offsets = [0, 32], sizes = [8, 32], strides = [1, 1]} : vector<8x128xf32> to vector<8x32xf32>
    %162 = vector.extract_strided_slice %159 {offsets = [0, 96], sizes = [8, 32], strides = [1, 1]} : vector<8x128xf32> to vector<8x32xf32>
    %163 = vector.extract_strided_slice %154 {offsets = [0, 64], sizes = [8, 32], strides = [1, 1]} : vector<8x128xf32> to vector<8x32xf32>
    %164 = math.tanh %163 : vector<8x32xf32>
    %165 = arith.mulf %161, %148 : vector<8x32xf32>
    %166 = arith.mulf %160, %164 : vector<8x32xf32>
    %167 = arith.addf %165, %166 : vector<8x32xf32>
    %168 = math.tanh %167 : vector<8x32xf32>
    %169 = arith.mulf %162, %168 : vector<8x32xf32>
    %170 = vector.extract_strided_slice %9 {offsets = [56, 0], sizes = [8, 32], strides = [1, 1]} : vector<64x32xbf16> to vector<8x32xbf16>
    %c0_28 = arith.constant 0 : index
    %c0_29 = arith.constant 0 : index
    %171 = vector.load %arg5[%c0_28, %c0_29] : memref<32x128xbf16, #tpu.memory_space<vmem>>, vector<32x128xbf16>
    %cst_30 = arith.constant dense<0.000000e+00> : vector<8x128xf32>
    %172 = tpu.matmul %170, %171, %cst_30 {dimension_numbers = #tpu.dot_dimension_numbers<[1], [0], [0], [1], [0, 0, 1, 1], [], []>} : vector<8x32xbf16>, vector<32x128xbf16>, vector<8x128xf32> -> vector<8x128xf32>
    %c0_31 = arith.constant 0 : index
    %c0_32 = arith.constant 0 : index
    %173 = vector.load %arg6[%c0_31, %c0_32] : memref<1x128xf32, #tpu.memory_space<vmem>>, vector<1x128xf32>
    %174 = vector.broadcast %173 : vector<1x128xf32> to vector<8x128xf32>
    %175 = arith.addf %172, %174 : vector<8x128xf32>
    %176 = arith.negf %175 : vector<8x128xf32>
    %177 = math.exp %176 : vector<8x128xf32>
    %cst_33 = arith.constant 1.000000e+00 : f32
    %178 = vector.broadcast %cst_33 : f32 to vector<8x128xf32>
    %179 = arith.addf %178, %177 : vector<8x128xf32>
    %180 = arith.divf %178, %179 : vector<8x128xf32>
    %181 = vector.extract_strided_slice %180 {offsets = [0, 0], sizes = [8, 32], strides = [1, 1]} : vector<8x128xf32> to vector<8x32xf32>
    %182 = vector.extract_strided_slice %180 {offsets = [0, 96], sizes = [8, 32], strides = [1, 1]} : vector<8x128xf32> to vector<8x32xf32>
    %183 = vector.extract_strided_slice %175 {offsets = [0, 64], sizes = [8, 32], strides = [1, 1]} : vector<8x128xf32> to vector<8x32xf32>
    %184 = math.tanh %183 : vector<8x32xf32>
    %185 = arith.mulf %181, %184 : vector<8x32xf32>
    %186 = math.tanh %185 : vector<8x32xf32>
    %187 = arith.mulf %182, %186 : vector<8x32xf32>
    %c0_34 = arith.constant 0 : index
    %c0_35 = arith.constant 0 : index
    %188 = vector.load %arg7[%c0_34, %c0_35] : memref<32x8xf32, #tpu.memory_space<vmem>>, vector<32x8xf32>
    %cst_36 = arith.constant dense<0.000000e+00> : vector<8x8xf32>
    %189 = tpu.matmul %169, %188, %cst_36 {dimension_numbers = #tpu.dot_dimension_numbers<[1], [0], [0], [1], [0, 0, 1, 1], [], []>} : vector<8x32xf32>, vector<32x8xf32>, vector<8x8xf32> -> vector<8x8xf32>
    %c0_37 = arith.constant 0 : index
    %c0_38 = arith.constant 0 : index
    %190 = vector.load %arg8[%c0_37, %c0_38] : memref<32x8xf32, #tpu.memory_space<vmem>>, vector<32x8xf32>
    %cst_39 = arith.constant dense<0.000000e+00> : vector<8x8xf32>
    %191 = tpu.matmul %187, %190, %cst_39 {dimension_numbers = #tpu.dot_dimension_numbers<[1], [0], [0], [1], [0, 0, 1, 1], [], []>} : vector<8x32xf32>, vector<32x8xf32>, vector<8x8xf32> -> vector<8x8xf32>
    %192 = arith.addf %189, %191 : vector<8x8xf32>
    %c0_40 = arith.constant 0 : index
    %c0_41 = arith.constant 0 : index
    %193 = vector.load %arg9[%c0_40, %c0_41] : memref<1x8xf32, #tpu.memory_space<vmem>>, vector<1x8xf32>
    %194 = vector.broadcast %193 : vector<1x8xf32> to vector<8x8xf32>
    %195 = arith.addf %192, %194 : vector<8x8xf32>
    %cst_42 = arith.constant dense<0.000000e+00> : vector<8xf32>
    %196 = vector.multi_reduction <add>, %195, %cst_42 [1] : vector<8x8xf32> to vector<8xf32>
    %197 = vector.shape_cast %196 : vector<8xf32> to vector<8x1xf32>
    %cst_43 = arith.constant 8.000000e+00 : f32
    %198 = vector.broadcast %cst_43 : f32 to vector<8x1xf32>
    %199 = arith.divf %197, %198 : vector<8x1xf32>
    %200 = vector.broadcast %199 : vector<8x1xf32> to vector<8x8xf32>
    %201 = arith.subf %195, %200 : vector<8x8xf32>
    %202 = arith.mulf %201, %201 : vector<8x8xf32>
    %cst_44 = arith.constant dense<0.000000e+00> : vector<8xf32>
    %203 = vector.multi_reduction <add>, %202, %cst_44 [1] : vector<8x8xf32> to vector<8xf32>
    %204 = vector.shape_cast %203 : vector<8xf32> to vector<8x1xf32>
    %cst_45 = arith.constant 8.000000e+00 : f32
    %205 = vector.broadcast %cst_45 : f32 to vector<8x1xf32>
    %206 = arith.divf %204, %205 : vector<8x1xf32>
    %207 = vector.broadcast %199 : vector<8x1xf32> to vector<8x8xf32>
    %208 = arith.subf %195, %207 : vector<8x8xf32>
    %cst_46 = arith.constant 9.99999974E-6 : f32
    %209 = vector.broadcast %cst_46 : f32 to vector<8x1xf32>
    %210 = arith.addf %206, %209 : vector<8x1xf32>
    %211 = math.rsqrt %210 : vector<8x1xf32>
    %212 = vector.broadcast %211 : vector<8x1xf32> to vector<8x8xf32>
    %213 = arith.mulf %208, %212 : vector<8x8xf32>
    %c0_47 = arith.constant 0 : index
    %c0_48 = arith.constant 0 : index
    %214 = vector.load %arg10[%c0_47, %c0_48] : memref<1x8xf32, #tpu.memory_space<vmem>>, vector<1x8xf32>
    %215 = vector.broadcast %214 : vector<1x8xf32> to vector<8x8xf32>
    %216 = arith.mulf %213, %215 : vector<8x8xf32>
    %c0_49 = arith.constant 0 : index
    %c0_50 = arith.constant 0 : index
    %217 = vector.load %arg11[%c0_49, %c0_50] : memref<1x8xf32, #tpu.memory_space<vmem>>, vector<1x8xf32>
    %218 = vector.broadcast %217 : vector<1x8xf32> to vector<8x8xf32>
    %219 = arith.addf %216, %218 : vector<8x8xf32>
    %c0_51 = arith.constant 0 : index
    %c0_52 = arith.constant 0 : index
    %220 = vector.load %arg12[%c0_51, %c0_52] : memref<8x8xf32, #tpu.memory_space<vmem>>, vector<8x8xf32>
    tpu.vector_store %arg12[%c0_51, %c0_52], %219 {strides = array<i32>} : memref<8x8xf32, #tpu.memory_space<vmem>>, vector<8x8xf32>,
    return
  }
}

</mosaic_0001>

<bundles_post_ra>
// kernel: lstm_model_forward.1
= control target key start
LH: loop header
LB: loop body
LE: loop exit
PB: predicated region body
PF: predicated region fallthrough
CT: control target
= control target key end

     0   :  { %v1137_v0 = vmov 0   ;;  %v42_v14 = vlaneseq  ;;  %v1138_v17 = vmov 1.0|1.0   ;;  %vm245_vm3 = vcmask 261120   ;;  %s1425_s0 = inlined_call_operand.vmem [shape: s32[64,1], index: 0, kind: input, shape index: {}]   ;;  %s1426_s1 = inlined_call_operand.vmem [shape: bf16[128,32], index: 1, kind: input, shape index: {}]   ;;  %s1427_s3 = inlined_call_operand.vmem [shape: bf16[32,128], index: 3, kind: input, shape index: {}]   ;;  %s1428_s2 = inlined_call_operand.vmem [shape: bf16[32,128], index: 2, kind: input, shape index: {}]   ;;  %s1429_s4 = inlined_call_operand.vmem [shape: f32[1,128], index: 4, kind: input, shape index: {}]   ;;  %s1430_s5 = inlined_call_operand.vmem [shape: bf16[32,128], index: 5, kind: input, shape index: {}]   ;;  %s1431_s6 = inlined_call_operand.vmem [shape: f32[1,128], index: 6, kind: input, shape index: {}]   ;;  %s1432_s8 = inlined_call_operand.vmem [shape: f32[32,8], index: 8, kind: input, shape index: {}]   ;;  %s1433_s7 = inlined_call_operand.vmem [shape: f32[32,8], index: 7, kind: input, shape index: {}]   ;;  %s1434_s9 = inlined_call_operand.vmem [shape: f32[1,8], index: 9, kind: input, shape index: {}]   ;;  %s1435_s10 = inlined_call_operand.vmem [shape: f32[1,8], index: 10, kind: input, shape index: {}]   ;;  %s1436_s11 = inlined_call_operand.vmem [shape: f32[1,8], index: 11, kind: input, shape index: {}]   ;;  %s1437_s12 = inlined_call_operand.vmem [shape: f32[8,8], index: 12, kind: output, shape index: {}]  }
   0x1   :  { %1053 = vset.pattern.permute.xlu0 %v1137_v0  ;;  %v44_v1 = vld [vmem:[%s1425_s0] sm:$0xff]  ;;  %1054 = vset.pattern.permute.xlu1 %v1137_v0  ;;  %v1040_v2 = vld [vmem:[%s1426_s1 + $0x38] sm:$0xff]  ;;  %v1039_v3 = vld [vmem:[%s1426_s1 + $0x30] sm:$0xff] }
   0x2   :  { %53 = vperm.xlu0 %1053, %v44_v1   ;;  %1055 = vset.pattern.permute.xlu2 %v1137_v0  ;;  %v45_v4 = vld [vmem:[%s1425_s0 + $0x8] sm:$0xff]  ;;  %v1037_v6 = vld [vmem:[%s1426_s1 + $0x20] sm:$0xff]  ;;  %v46_v7 = vld [vmem:[%s1425_s0 + $0x10] sm:$0xff]  ;;  %v1248_v15 = vand.u32 127, %v42_v14 }
   0x3   :  { %168 = vmatpush.bf16.msra.mxu0 %v1040_v2  ;;  %v1038_v5 = vld [vmem:[%s1426_s1 + $0x28] sm:$0xff]  ;;  %v1036_v8 = vld [vmem:[%s1426_s1 + $0x18] sm:$0xff]  ;;  %v1035_v9 = vld [vmem:[%s1426_s1 + $0x10] sm:$0xff] }
   0x4   :  { %v1034_v10 = vld [vmem:[%s1426_s1 + $0x8] sm:$0xff]  ;;  %v1033_v11 = vld [vmem:[%s1426_s1] sm:$0xff]  ;;  %v47_v50 = vld [vmem:[%s1425_s0 + $0x18] sm:$0xff] }
   0x5   :  { %v1244_v12 = vld [vmem:[%s1427_s3 + $0x8] sm:$0xff]  ;;  %v1256_v18 = vld [vmem:[%s1427_s3] sm:$0xff] }
   0x6   :  { %312 = vmatpush.bf16.msra.mxu2 %v1244_v12  ;;  %370 = vmatpush.bf16.msra.mxu3 %v1244_v12  ;;  %v1042_v19 = vld [vmem:[%s1428_s2 + $0x8] sm:$0xff]  ;;  %v1041_v20 = vld [vmem:[%s1428_s2] sm:$0xff]  ;;  %s1139_s2 = smov 64  }
   0x7   :  { %169 = vmatpush.bf16.msra.mxu0 %v1039_v3  ;;  %264 = vmatpush.bf16.msra.mxu1 %v1042_v19  ;;  %v1276_v30 = vld [vmem:[%s1429_s4] ss:$0 sm:$0xff]  ;;  %s1140_s4 = smov 32  }
   0xa   :  { %56 = vperm.xlu0 %1053, %v45_v4   ;;  %313 = vmatpush.bf16.msra.mxu2 %v1256_v18 }
   0xb   :  { %170 = vmatpush.bf16.msra.mxu0 %v1038_v5  ;;  %371 = vmatpush.bf16.msra.mxu3 %v1256_v18 }
   0xc   :  { %265 = vmatpush.bf16.msra.mxu1 %v1041_v20 }
   0xd   :  { %314 = vmatmul.bf16.vlgmr.msra.gmra.mxu2 %v1137_v0 }
   0xe   :  { %428 = vmatpush.bf16.msrb.mxu2 %v1244_v12 }
   0xf   :  { %171 = vmatpush.bf16.msra.mxu0 %v1037_v6  ;;  %486 = vmatpush.bf16.msrb.mxu3 %v1244_v12 }
  0x12   :  { %59 = vperm.xlu0 %1053, %v46_v7   ;;  %429 = vmatpush.bf16.msrb.mxu2 %v1256_v18 }
  0x13   :  { %172 = vmatpush.bf16.msra.mxu0 %v1036_v8  ;;  %487 = vmatpush.bf16.msrb.mxu3 %v1256_v18 }
  0x16   :  { %544 = vmatpush.bf16.msra.mxu2 %v1244_v12 }
  0x17   :  { %173 = vmatpush.bf16.msra.mxu0 %v1035_v9 }
  0x1a   :  { %545 = vmatpush.bf16.msra.mxu2 %v1256_v18 }
  0x1b   :  { %174 = vmatpush.bf16.msra.mxu0 %v1034_v10 }
  0x1f   :  { %175 = vmatpush.bf16.msra.mxu0 %v1033_v11 }
  0x74   :  { %v54_v13 = vpop.permute.xlu0 %53 }
  0x75   :  { %vm76_vm0 = vcmp.eq.s32.totalorder %v54_v13, %v1248_v15 }
  0x7c   :  { %v57_v16 = vpop.permute.xlu0 %56 }
  0x7d   :  { %vm77_vm1 = vcmp.eq.s32.totalorder %v57_v16, %v1248_v15 }
  0x7e   :  { %vm978_vm2 = vmpackc.low %vm77_vm1, %vm76_vm0 }
  0x7f   :  { %979 = vmatmul.msk.bf16.vlgmr.msra.gmra.mxu0 %vm978_vm2, %v1138_v17 }
  0x84   :  { %v60_v54 = vpop.permute.xlu0 %59 }
  0x85   :  { %vm78_vm8 = vcmp.eq.s32.totalorder %v60_v54, %v1248_v15 }
  0x90   :  { %v315_v28 = vpop.f32.mrf.mxu2 }
  0x98   :  { %v317_v29 = vpop.f32.mrf.mxu2 }
  0xfc   :  { %v177_v21 = vpop.f32.mrf.mxu0 }
  0xfd   :  { %v197_v22 = vpack.c.bf16 %v177_v21, %v177_v21 }
  0xff   :  { %v221_v25 = vunpack.c.l.b16 %v197_v22 }
 0x104   :  { %v179_v23 = vpop.f32.mrf.mxu0 }
 0x105   :  { %v198_v24 = vpack.c.bf16 %v179_v23, %v179_v23 }
 0x107   :  { %v222_v26 = vunpack.c.l.b16 %v198_v24 }
 0x109   :  { %v229_v27 = vpack.c.b16 %v222_v26, %v221_v25 }
 0x10b   :  { %994 = vmatmul.msk.bf16.vlgmr.msra.gmra.mxu1 %vm245_vm3, %v229_v27 }
 0x188   :  { %v267_v31 = vpop.f32.mrf.mxu1 }
 0x189   :  { %v268_v32 = vadd.f32 %v1276_v30, %v267_v31 }
 0x18b   :  { %v319_v33 = vadd.f32 %v315_v28, %v268_v32 }
 0x18d   :  { %1061 = vtanh.f32 %v319_v33  ;;  %v1006_v35 = vmul.f32 -1.442695, %v319_v33 }
 0x18f   :  { %1063 = vpow2.f32 %v1006_v35 }
 0x190   :  { %v269_v4 = vpop.f32.mrf.mxu1 }
 0x191   :  { %v270_v5 = vadd.f32 %v1276_v30, %v269_v4 }
 0x193   :  { %v1062_v34 = vpop.eup %1061 }
 0x194   :  { %342 = vrot.lane.b32.xlu1 %v1062_v34, %s1139_s2 }
 0x195   :  { %v1064_v36 = vpop.eup %1063 }
 0x196   :  { %v323_v37 = vadd.f32 1.0, %v1064_v36 }
 0x198   :  { %1065 = vrcp.f32 %v323_v37  ;;  %v335_v43 = vand.u32 2147483648, %v323_v37  ;;  %vm329_vm5 = vweird.f32 %v323_v37  ;;  %v333_v44 = vand.u32 2147483647, %v323_v37 }
 0x19a   :  { %v336_v46 = vor.u32 1.1754944e-38, %v335_v43  ;;  %vm334_vm7 = vcmp.eq.f32.partialorder %v333_v44, 8.507059e+37 }
 0x19e   :  { %v1066_v38 = vpop.eup %1065 }
 0x19f   :  { %v325_v39 = vmul.f32 %v1066_v38, %v323_v37  ;;  %vm330_vm4 = vweird.f32 %v1066_v38 }
 0x1a0   :  { %vm331_vm6 = vmor %vm329_vm5, %vm330_vm4 }
 0x1a1   :  { %v326_v40 = vsub.f32 1.0, %v325_v39 }
 0x1a3   :  { %v327_v41 = vmul.f32 %v1066_v38, %v326_v40 }
 0x1a5   :  { %v328_v42 = vadd.f32 %v1066_v38, %v327_v41 }
 0x1a7   :  { %v332_v45 = vsel %vm331_vm6, %v1066_v38, %v328_v42 }
 0x1a8   :  { %v337_v48 = vsel %vm334_vm7, %v336_v46, %v332_v45 }
 0x1a9   :  { %v340_v51 = vmul.f32 0.0, %v337_v48 }
 0x206   :  { %v343_v47 = vpop.permute.xlu1 %342 }
 0x207   :  { %v345_v49 = vmul.f32 %v343_v47, %v337_v48 }
 0x209   :  { %347 = vrot.lane.b32.xlu1 %v345_v49, %s1140_s4 }
 0x211   :  { %62 = vperm.xlu1 %1054, %v47_v50  }
 0x27b   :  { %v348_v52 = vpop.permute.xlu1 %347 }
 0x27c   :  { %v350_v53 = vadd.f32 %v348_v52, %v340_v51 }
 0x27e   :  { %1067 = vtanh.f32 %v350_v53 }
 0x283   :  { %v63_v55 = vpop.permute.xlu1 %62 }
 0x284   :  { %v1068_v56 = vpop.eup %1067  ;;  %vm79_vm9 = vcmp.eq.s32.totalorder %v63_v55, %v1248_v15 }
 0x285   :  { %vm980_vm10 = vmpackc.low %vm79_vm9, %vm78_vm8  ;;  %353 = vrot.lane.b32.xlu2 %v1068_v56, %s1139_s2 }
 0x286   :  { %981 = vmatmul.msk.bf16.gmra.mxu0 %vm980_vm10, %v1138_v17 }
 0x2df   :  { %v354_v57 = vpop.permute.xlu2 %353 }
 0x2e0   :  { %v356_v58 = vmul.f32 %v354_v57, %v337_v48 }
 0x2e2   :  { %v357_v59 = vpack.c.bf16 %v356_v58, %v356_v58 }
 0x2e4   :  { %359 = vrot.lane.b32.xlu2 %v357_v59, %s1140_s4  ;;  %v48_v59 = vld [vmem:[%s1425_s0 + $0x20] sm:$0xff] }
 0x303   :  { %v182_v60 = vpop.f32.mrf.mxu0 }
 0x304   :  { %v199_v61 = vpack.c.bf16 %v182_v60, %v182_v60 }
 0x306   :  { %v223_v0 = vunpack.c.l.b16 %v199_v61 }
 0x30b   :  { %v184_v62 = vpop.f32.mrf.mxu0 }
 0x30c   :  { %v200_v63 = vpack.c.bf16 %v184_v62, %v184_v62 }
 0x30e   :  { %v224_v1 = vunpack.c.l.b16 %v200_v63 }
 0x310   :  { %v230_v2 = vpack.c.b16 %v224_v1, %v223_v0  ;;  %v49_v0 = vld [vmem:[%s1425_s0 + $0x28] sm:$0xff] }
 0x312   :  { %995 = vmatmul.msk.bf16.gmra.mxu1 %vm245_vm3, %v230_v2 }
 0x33e   :  { %v360_v3 = vpop.permute.xlu2 %359 }
 0x33f   :  { %1007 = vmatmul.msk.bf16.vlgmr.msra.gmra.mxu3 %vm245_vm3, %v360_v3 }
 0x340   :  { %602 = vmatpush.bf16.msra.mxu3 %v1244_v12 }
 0x344   :  { %603 = vmatpush.bf16.msra.mxu3 %v1256_v18 }
 0x38f   :  { %v272_v38 = vpop.f32.mrf.mxu1 }
 0x390   :  { %v273_v39 = vadd.f32 %v1276_v30, %v272_v38 }
 0x3c2   :  { %v373_v6 = vpop.f32.mrf.mxu3 }
 0x3c3   :  { %v377_v7 = vadd.f32 %v373_v6, %v270_v5 }
 0x3c5   :  { %1069 = vtanh.f32 %v377_v7  ;;  %v1008_v10 = vmul.f32 -1.442695, %v377_v7 }
 0x3c7   :  { %1071 = vpow2.f32 %v1008_v10 }
 0x3ca   :  { %v375_v8 = vpop.f32.mrf.mxu3 }
 0x3cb   :  { %v1070_v9 = vpop.eup %1069 }
 0x3cc   :  { %400 = vrot.lane.b32.xlu2 %v1070_v9, %s1139_s2 }
 0x3cd   :  { %v1072_v11 = vpop.eup %1071 }
 0x3ce   :  { %v381_v13 = vadd.f32 1.0, %v1072_v11 }
 0x3d0   :  { %1073 = vrcp.f32 %v381_v13  ;;  %v393_v22 = vand.u32 2147483648, %v381_v13  ;;  %vm387_vm12 = vweird.f32 %v381_v13  ;;  %v391_v23 = vand.u32 2147483647, %v381_v13 }
 0x3d2   :  { %v394_v25 = vor.u32 1.1754944e-38, %v393_v22  ;;  %vm392_vm14 = vcmp.eq.f32.partialorder %v391_v23, 8.507059e+37 }
 0x3d6   :  { %v1074_v14 = vpop.eup %1073 }
 0x3d7   :  { %v383_v16 = vmul.f32 %v1074_v14, %v381_v13  ;;  %vm388_vm11 = vweird.f32 %v1074_v14 }
 0x3d8   :  { %vm389_vm13 = vmor %vm387_vm12, %vm388_vm11 }
 0x3d9   :  { %v384_v19 = vsub.f32 1.0, %v383_v16  ;;  %v274_v16 = vpop.f32.mrf.mxu1 }
 0x3db   :  { %v385_v20 = vmul.f32 %v1074_v14, %v384_v19  ;;  %v275_v19 = vadd.f32 %v1276_v30, %v274_v16 }
 0x3dd   :  { %v386_v21 = vadd.f32 %v1074_v14, %v385_v20 }
 0x3df   :  { %v390_v24 = vsel %vm389_vm13, %v1074_v14, %v386_v21 }
 0x3e0   :  { %v395_v27 = vsel %vm392_vm14, %v394_v25, %v390_v24 }
 0x3e1   :  { %v398_v29 = vmul.f32 %v395_v27, %v350_v53 }
 0x426   :  { %v401_v26 = vpop.permute.xlu2 %400 }
 0x427   :  { %v403_v28 = vmul.f32 %v401_v26, %v395_v27 }
 0x429   :  { %405 = vrot.lane.b32.xlu0 %v403_v28, %s1140_s4 }
 0x49b   :  { %v406_v31 = vpop.permute.xlu0 %405 }
 0x49c   :  { %v408_v32 = vadd.f32 %v406_v31, %v398_v29 }
 0x49e   :  { %1075 = vtanh.f32 %v408_v32 }
 0x4a4   :  { %v1076_v33 = vpop.eup %1075 }
 0x4a5   :  { %411 = vrot.lane.b32.xlu1 %v1076_v33, %s1139_s2 }
 0x517   :  { %v412_v34 = vpop.permute.xlu1 %411 }
 0x518   :  { %v414_v35 = vmul.f32 %v412_v34, %v395_v27 }
 0x51a   :  { %v415_v36 = vpack.c.bf16 %v414_v35, %v414_v35 }
 0x51c   :  { %417 = vrot.lane.b32.xlu2 %v415_v36, %s1140_s4 }
 0x576   :  { %v418_v37 = vpop.permute.xlu2 %417 }
 0x577   :  { %1009 = vmatmul.msk.bf16.vlgmr.msrb.gmra.mxu2 %vm245_vm3, %v418_v37 }
 0x578   :  { %660 = vmatpush.bf16.msrb.mxu2 %v1244_v12 }
 0x57c   :  { %661 = vmatpush.bf16.msrb.mxu2 %v1256_v18 }
 0x5fa   :  { %v431_v40 = vpop.f32.mrf.mxu2 }
 0x5fb   :  { %v435_v41 = vadd.f32 %v431_v40, %v273_v39 }
 0x5fd   :  { %1077 = vtanh.f32 %v435_v41  ;;  %v1010_v44 = vmul.f32 -1.442695, %v435_v41 }
 0x5ff   :  { %1079 = vpow2.f32 %v1010_v44 }
 0x602   :  { %v433_v42 = vpop.f32.mrf.mxu2 }
 0x603   :  { %v1078_v43 = vpop.eup %1077 }
 0x604   :  { %458 = vrot.lane.b32.xlu0 %v1078_v43, %s1139_s2 }
 0x605   :  { %v1080_v45 = vpop.eup %1079 }
 0x606   :  { %v439_v46 = vadd.f32 1.0, %v1080_v45 }
 0x608   :  { %1081 = vrcp.f32 %v439_v46  ;;  %v451_v52 = vand.u32 2147483648, %v439_v46  ;;  %vm445_vm0 = vweird.f32 %v439_v46  ;;  %v449_v53 = vand.u32 2147483647, %v439_v46 }
 0x60a   :  { %v452_v55 = vor.u32 1.1754944e-38, %v451_v52  ;;  %vm450_vm2 = vcmp.eq.f32.partialorder %v449_v53, 8.507059e+37 }
 0x60e   :  { %v1082_v47 = vpop.eup %1081 }
 0x60f   :  { %v441_v48 = vmul.f32 %v1082_v47, %v439_v46  ;;  %vm446_vm15 = vweird.f32 %v1082_v47 }
 0x610   :  { %vm447_vm1 = vmor %vm445_vm0, %vm446_vm15 }
 0x611   :  { %v442_v49 = vsub.f32 1.0, %v441_v48 }
 0x613   :  { %v443_v50 = vmul.f32 %v1082_v47, %v442_v49 }
 0x615   :  { %v444_v51 = vadd.f32 %v1082_v47, %v443_v50 }
 0x617   :  { %v448_v54 = vsel %vm447_vm1, %v1082_v47, %v444_v51 }
 0x618   :  { %v453_v57 = vsel %vm450_vm2, %v452_v55, %v448_v54 }
 0x619   :  { %v456_v60 = vmul.f32 %v453_v57, %v408_v32 }
 0x676   :  { %v459_v56 = vpop.permute.xlu0 %458 }
 0x677   :  { %v461_v58 = vmul.f32 %v459_v56, %v453_v57 }
 0x679   :  { %463 = vrot.lane.b32.xlu1 %v461_v58, %s1140_s4 }
 0x681   :  { %65 = vperm.xlu1 %1054, %v48_v59  }
 0x6eb   :  { %v464_v61 = vpop.permute.xlu1 %463 }
 0x6ec   :  { %v466_v62 = vadd.f32 %v464_v61, %v456_v60 }
 0x6ee   :  { %1083 = vtanh.f32 %v466_v62 }
 0x6f3   :  { %v66_v4 = vpop.permute.xlu1 %65 }
 0x6f4   :  { %v1084_v63 = vpop.eup %1083  ;;  %vm80_vm4 = vcmp.eq.s32.totalorder %v66_v4, %v1248_v15 }
 0x6f5   :  { %469 = vrot.lane.b32.xlu2 %v1084_v63, %s1139_s2 }
 0x6fd   :  { %68 = vperm.xlu2 %1055, %v49_v0  }
 0x74f   :  { %v470_v1 = vpop.permute.xlu2 %469 }
 0x750   :  { %v472_v2 = vmul.f32 %v470_v1, %v453_v57 }
 0x752   :  { %v473_v3 = vpack.c.bf16 %v472_v2, %v472_v2 }
 0x754   :  { %475 = vrot.lane.b32.xlu0 %v473_v3, %s1140_s4  ;;  %v50_v3 = vld [vmem:[%s1425_s0 + $0x30] sm:$0xff] }
 0x757   :  { %v69_v5 = vpop.permute.xlu2 %68 }
 0x758   :  { %vm81_vm5 = vcmp.eq.s32.totalorder %v69_v5, %v1248_v15 }
 0x759   :  { %vm982_vm6 = vmpackc.low %vm81_vm5, %vm80_vm4 }
 0x75a   :  { %983 = vmatmul.msk.bf16.gmra.mxu0 %vm982_vm6, %v1138_v17 }
 0x7c6   :  { %v476_v6 = vpop.permute.xlu0 %475 }
 0x7c7   :  { %1011 = vmatmul.msk.bf16.vlgmr.msrb.gmra.mxu3 %vm245_vm3, %v476_v6 }
 0x7c8   :  { %718 = vmatpush.bf16.msrb.mxu3 %v1244_v12 }
 0x7cc   :  { %719 = vmatpush.bf16.msrb.mxu3 %v1256_v18 }
 0x7d7   :  { %v187_v7 = vpop.f32.mrf.mxu0 }
 0x7d8   :  { %v201_v8 = vpack.c.bf16 %v187_v7, %v187_v7 }
 0x7da   :  { %v225_v11 = vunpack.c.l.b16 %v201_v8  ;;  %v51_v8 = vld [vmem:[%s1425_s0 + $0x38] sm:$0xff] }
 0x7df   :  { %v189_v9 = vpop.f32.mrf.mxu0 }
 0x7e0   :  { %v202_v10 = vpack.c.bf16 %v189_v9, %v189_v9 }
 0x7e2   :  { %v226_v13 = vunpack.c.l.b16 %v202_v10 }
 0x7e4   :  { %v231_v14 = vpack.c.b16 %v226_v13, %v225_v11 }
 0x7e6   :  { %996 = vmatmul.msk.bf16.gmra.mxu1 %vm245_vm3, %v231_v14 }
 0x84a   :  { %v489_v20 = vpop.f32.mrf.mxu3 }
 0x84b   :  { %v493_v21 = vadd.f32 %v489_v20, %v275_v19  ;;  %v1046_v19 = vld [vmem:[%s1430_s5 + $0x8] sm:$0xff]  ;;  %v1045_v20 = vld [vmem:[%s1430_s5] sm:$0xff] }
 0x84c   :  { %792 = vmatpush.bf16.msrb.mxu1 %v1046_v19 }
 0x84d   :  { %1085 = vtanh.f32 %v493_v21  ;;  %v1012_v12 = vmul.f32 -1.442695, %v493_v21 }
 0x84f   :  { %1087 = vpow2.f32 %v1012_v12 }
 0x850   :  { %793 = vmatpush.bf16.msrb.mxu1 %v1045_v20 }
 0x852   :  { %v491_v22 = vpop.f32.mrf.mxu3 }
 0x853   :  { %v1086_v23 = vpop.eup %1085 }
 0x854   :  { %516 = vrot.lane.b32.xlu0 %v1086_v23, %s1139_s2 }
 0x855   :  { %v1088_v18 = vpop.eup %1087 }
 0x856   :  { %v497_v24 = vadd.f32 1.0, %v1088_v18 }
 0x858   :  { %1089 = vrcp.f32 %v497_v24  ;;  %v509_v31 = vand.u32 2147483648, %v497_v24  ;;  %vm503_vm8 = vweird.f32 %v497_v24  ;;  %v507_v32 = vand.u32 2147483647, %v497_v24 }
 0x85a   :  { %v510_v34 = vor.u32 1.1754944e-38, %v509_v31  ;;  %vm508_vm10 = vcmp.eq.f32.partialorder %v507_v32, 8.507059e+37 }
 0x85e   :  { %v1090_v25 = vpop.eup %1089 }
 0x85f   :  { %v499_v26 = vmul.f32 %v1090_v25, %v497_v24  ;;  %vm504_vm7 = vweird.f32 %v1090_v25 }
 0x860   :  { %vm505_vm9 = vmor %vm503_vm8, %vm504_vm7 }
 0x861   :  { %v500_v27 = vsub.f32 1.0, %v499_v26 }
 0x863   :  { %v501_v28 = vmul.f32 %v1090_v25, %v500_v27  ;;  %v277_v46 = vpop.f32.mrf.mxu1 }
 0x864   :  { %v278_v47 = vadd.f32 %v1276_v30, %v277_v46 }
 0x865   :  { %v502_v29 = vadd.f32 %v1090_v25, %v501_v28 }
 0x867   :  { %v506_v33 = vsel %vm505_vm9, %v1090_v25, %v502_v29 }
 0x868   :  { %v511_v36 = vsel %vm508_vm10, %v510_v34, %v506_v33 }
 0x869   :  { %v514_v38 = vmul.f32 %v511_v36, %v466_v62 }
 0x86b   :  { %v279_v24 = vpop.f32.mrf.mxu1 }
 0x86c   :  { %v280_v25 = vadd.f32 %v1276_v30, %v279_v24 }
 0x8c6   :  { %v517_v35 = vpop.permute.xlu0 %516 }
 0x8c7   :  { %v519_v37 = vmul.f32 %v517_v35, %v511_v36 }
 0x8c9   :  { %521 = vrot.lane.b32.xlu1 %v519_v37, %s1140_s4 }
 0x93b   :  { %v522_v39 = vpop.permute.xlu1 %521 }
 0x93c   :  { %v524_v40 = vadd.f32 %v522_v39, %v514_v38 }
 0x93e   :  { %1091 = vtanh.f32 %v524_v40 }
 0x944   :  { %v1092_v41 = vpop.eup %1091 }
 0x945   :  { %527 = vrot.lane.b32.xlu2 %v1092_v41, %s1139_s2 }
 0x99f   :  { %v528_v42 = vpop.permute.xlu2 %527 }
 0x9a0   :  { %v530_v43 = vmul.f32 %v528_v42, %v511_v36 }
 0x9a2   :  { %v531_v44 = vpack.c.bf16 %v530_v43, %v530_v43 }
 0x9a4   :  { %533 = vrot.lane.b32.xlu0 %v531_v44, %s1140_s4 }
 0xa16   :  { %v534_v45 = vpop.permute.xlu0 %533 }
 0xa17   :  { %1013 = vmatmul.msk.bf16.vlgmr.msra.gmra.mxu2 %vm245_vm3, %v534_v45 }
 0xa9a   :  { %v547_v48 = vpop.f32.mrf.mxu2 }
 0xa9b   :  { %v551_v49 = vadd.f32 %v547_v48, %v278_v47 }
 0xa9d   :  { %1093 = vtanh.f32 %v551_v49  ;;  %v1014_v52 = vmul.f32 -1.442695, %v551_v49 }
 0xa9f   :  { %1095 = vpow2.f32 %v1014_v52 }
 0xaa2   :  { %v549_v50 = vpop.f32.mrf.mxu2 }
 0xaa3   :  { %v1094_v51 = vpop.eup %1093 }
 0xaa4   :  { %574 = vrot.lane.b32.xlu1 %v1094_v51, %s1139_s2 }
 0xaa5   :  { %v1096_v53 = vpop.eup %1095 }
 0xaa6   :  { %v555_v54 = vadd.f32 1.0, %v1096_v53 }
 0xaa8   :  { %1097 = vrcp.f32 %v555_v54  ;;  %v567_v60 = vand.u32 2147483648, %v555_v54  ;;  %vm561_vm12 = vweird.f32 %v555_v54  ;;  %v565_v61 = vand.u32 2147483647, %v555_v54 }
 0xaaa   :  { %v568_v63 = vor.u32 1.1754944e-38, %v567_v60  ;;  %vm566_vm14 = vcmp.eq.f32.partialorder %v565_v61, 8.507059e+37 }
 0xaae   :  { %v1098_v55 = vpop.eup %1097 }
 0xaaf   :  { %v557_v56 = vmul.f32 %v1098_v55, %v555_v54  ;;  %vm562_vm11 = vweird.f32 %v1098_v55 }
 0xab0   :  { %vm563_vm13 = vmor %vm561_vm12, %vm562_vm11 }
 0xab1   :  { %v558_v57 = vsub.f32 1.0, %v557_v56 }
 0xab3   :  { %v559_v58 = vmul.f32 %v1098_v55, %v558_v57 }
 0xab5   :  { %v560_v59 = vadd.f32 %v1098_v55, %v559_v58 }
 0xab7   :  { %v564_v62 = vsel %vm563_vm13, %v1098_v55, %v560_v59 }
 0xab8   :  { %v569_v1 = vsel %vm566_vm14, %v568_v63, %v564_v62 }
 0xab9   :  { %v572_v4 = vmul.f32 %v569_v1, %v524_v40 }
 0xb16   :  { %v575_v0 = vpop.permute.xlu1 %574 }
 0xb17   :  { %v577_v2 = vmul.f32 %v575_v0, %v569_v1 }
 0xb19   :  { %579 = vrot.lane.b32.xlu2 %v577_v2, %s1140_s4 }
 0xb21   :  { %71 = vperm.xlu2 %1055, %v50_v3  }
 0xb73   :  { %v580_v5 = vpop.permute.xlu2 %579 }
 0xb74   :  { %v1331_v6 = vadd.f32 %v580_v5, %v572_v4 }
 0xb76   :  { %1099 = vtanh.f32 %v1331_v6 }
 0xb7b   :  { %v72_v13 = vpop.permute.xlu2 %71 }
 0xb7c   :  { %v1100_v7 = vpop.eup %1099  ;;  %vm82_vm15 = vcmp.eq.s32.totalorder %v72_v13, %v1248_v15 }
 0xb7d   :  { %585 = vrot.lane.b32.xlu0 %v1100_v7, %s1139_s2 }
 0xb85   :  { %74 = vperm.xlu0 %1053, %v51_v8  }
 0xbef   :  { %v586_v9 = vpop.permute.xlu0 %585 }
 0xbf0   :  { %v588_v10 = vmul.f32 %v586_v9, %v569_v1 }
 0xbf2   :  { %v589_v11 = vpack.c.bf16 %v588_v10, %v588_v10 }
 0xbf4   :  { %591 = vrot.lane.b32.xlu1 %v589_v11, %s1140_s4 }
 0xbf7   :  { %v75_v14 = vpop.permute.xlu0 %74 }
 0xbf8   :  { %vm83_vm0 = vcmp.eq.s32.totalorder %v75_v14, %v1248_v15 }
 0xbf9   :  { %vm984_vm1 = vmpackc.low %vm83_vm0, %vm82_vm15 }
 0xbfa   :  { %985 = vmatmul.msk.bf16.gmra.mxu0 %vm984_vm1, %v1138_v17 }
 0xc66   :  { %v592_v16 = vpop.permute.xlu1 %591 }
 0xc67   :  { %1015 = vmatmul.msk.bf16.vlgmr.msra.gmra.mxu3 %vm245_vm3, %v592_v16 }
 0xc77   :  { %v192_v21 = vpop.f32.mrf.mxu0 }
 0xc78   :  { %v203_v22 = vpack.c.bf16 %v192_v21, %v192_v21 }
 0xc7a   :  { %v227_v12 = vunpack.c.l.b16 %v203_v22  ;;  %v1057_v22 = vld [vmem:[%s1431_s6] ss:$0 sm:$0xff]  ;;  %s1141_s6 = smov 96  }
 0xc7f   :  { %v194_v23 = vpop.f32.mrf.mxu0 }
 0xc80   :  { %v204_v15 = vpack.c.bf16 %v194_v23, %v194_v23 }
 0xc82   :  { %v228_v18 = vunpack.c.l.b16 %v204_v15 }
 0xc84   :  { %v232_v17 = vpack.c.b16 %v228_v18, %v227_v12 }
 0xc86   :  { %997 = vmatmul.msk.bf16.gmra.mxu1 %vm245_vm3, %v232_v17 }
 0xc96   :  { %1029 = vmatmul.msk.bf16.vlgmr.msrb.gmra.mxu1 %vm245_vm3, %v204_v15 }
 0xcea   :  { %v605_v26 = vpop.f32.mrf.mxu3 }
 0xceb   :  { %v609_v27 = vadd.f32 %v605_v26, %v280_v25 }
 0xced   :  { %1101 = vtanh.f32 %v609_v27  ;;  %v1016_v35 = vmul.f32 -1.442695, %v609_v27 }
 0xcef   :  { %1103 = vpow2.f32 %v1016_v35 }
 0xcf2   :  { %v607_v28 = vpop.f32.mrf.mxu3 }
 0xcf3   :  { %v1102_v29 = vpop.eup %1101 }
 0xcf4   :  { %632 = vrot.lane.b32.xlu1 %v1102_v29, %s1139_s2 }
 0xcf5   :  { %v1104_v36 = vpop.eup %1103 }
 0xcf6   :  { %v613_v37 = vadd.f32 1.0, %v1104_v36 }
 0xcf8   :  { %1105 = vrcp.f32 %v613_v37  ;;  %v625_v43 = vand.u32 2147483648, %v613_v37  ;;  %vm619_vm4 = vweird.f32 %v613_v37  ;;  %v623_v44 = vand.u32 2147483647, %v613_v37 }
 0xcfa   :  { %v626_v46 = vor.u32 1.1754944e-38, %v625_v43  ;;  %vm624_vm6 = vcmp.eq.f32.partialorder %v623_v44, 8.507059e+37 }
 0xcfe   :  { %v1106_v38 = vpop.eup %1105 }
 0xcff   :  { %v615_v39 = vmul.f32 %v1106_v38, %v613_v37  ;;  %vm620_vm2 = vweird.f32 %v1106_v38 }
 0xd00   :  { %vm621_vm5 = vmor %vm619_vm4, %vm620_vm2  ;;  %vm893_vm4 = vcmask 64512  }
 0xd01   :  { %v616_v40 = vsub.f32 1.0, %v615_v39 }
 0xd03   :  { %v282_v31 = vpop.f32.mrf.mxu1  ;;  %v617_v41 = vmul.f32 %v1106_v38, %v616_v40 }
 0xd04   :  { %v283_v58 = vadd.f32 %v1276_v30, %v282_v31 }
 0xd05   :  { %v618_v42 = vadd.f32 %v1106_v38, %v617_v41 }
 0xd07   :  { %v622_v45 = vsel %vm621_vm5, %v1106_v38, %v618_v42 }
 0xd08   :  { %v627_v48 = vsel %vm624_vm6, %v626_v46, %v622_v45 }
 0xd09   :  { %v630_v50 = vmul.f32 %v627_v48, %v1331_v6 }
 0xd0b   :  { %v1353_v32 = vpop.f32.mrf.mxu1 }
 0xd0c   :  { %v285_v25 = vadd.f32 %v1276_v30, %v1353_v32 }
 0xd13   :  { %v1355_v33 = vpop.f32.mrf.mxu1 }
 0xd14   :  { %v796_v12 = vadd.f32 %v1057_v22, %v1355_v33 }
 0xd16   :  { %v1030_v31 = vmul.f32 -1.442695, %v796_v12 }
 0xd1b   :  { %v797_v34 = vpop.f32.mrf.mxu1 }
 0xd66   :  { %v633_v47 = vpop.permute.xlu1 %632 }
 0xd67   :  { %v635_v49 = vmul.f32 %v633_v47, %v627_v48 }
 0xd69   :  { %637 = vrot.lane.b32.xlu2 %v635_v49, %s1140_s4 }
 0xdc3   :  { %v638_v51 = vpop.permute.xlu2 %637 }
 0xdc4   :  { %v640_v52 = vadd.f32 %v638_v51, %v630_v50 }
 0xdc6   :  { %1107 = vtanh.f32 %v640_v52 }
 0xdcc   :  { %v1108_v53 = vpop.eup %1107 }
 0xdcd   :  { %643 = vrot.lane.b32.xlu0 %v1108_v53, %s1139_s2 }
 0xe3f   :  { %v644_v54 = vpop.permute.xlu0 %643 }
 0xe40   :  { %v646_v55 = vmul.f32 %v644_v54, %v627_v48 }
 0xe42   :  { %v647_v56 = vpack.c.bf16 %v646_v55, %v646_v55 }
 0xe44   :  { %649 = vrot.lane.b32.xlu1 %v647_v56, %s1140_s4 }
 0xeb6   :  { %v650_v57 = vpop.permute.xlu1 %649 }
 0xeb7   :  { %1017 = vmatmul.msk.bf16.vlgmr.msrb.gmra.mxu2 %vm245_vm3, %v650_v57 }
 0xf3a   :  { %v663_v59 = vpop.f32.mrf.mxu2 }
 0xf3b   :  { %v667_v60 = vadd.f32 %v663_v59, %v283_v58 }
 0xf3d   :  { %1109 = vtanh.f32 %v667_v60  ;;  %v1018_v63 = vmul.f32 -1.442695, %v667_v60 }
 0xf3f   :  { %1111 = vpow2.f32 %v1018_v63  ;;  %v835_v63 = vld [vmem:[%s1432_s8 + $0x8] sm:$0xff] }
 0xf42   :  { %v665_v61 = vpop.f32.mrf.mxu2 }
 0xf43   :  { %v1110_v62 = vpop.eup %1109  ;;  %v837_v61 = vld [vmem:[%s1432_s8 + $0x18] sm:$0xff] }
 0xf44   :  { %690 = vrot.lane.b32.xlu2 %v1110_v62, %s1139_s2  ;;  %v836_v62 = vld [vmem:[%s1432_s8 + $0x10] sm:$0xff]  ;;  %855 = vmatpush.msra.mxu2 %v837_v61 }
 0xf45   :  { %v1112_v0 = vpop.eup %1111 }
 0xf46   :  { %v671_v1 = vadd.f32 1.0, %v1112_v0  ;;  %856 = vmatpush.msra.mxu2 %v836_v62  ;;  %v834_v0 = vld [vmem:[%s1432_s8] sm:$0xff] }
 0xf48   :  { %1113 = vrcp.f32 %v671_v1  ;;  %v683_v7 = vand.u32 2147483648, %v671_v1  ;;  %vm677_vm8 = vweird.f32 %v671_v1  ;;  %v681_v8 = vand.u32 2147483647, %v671_v1  ;;  %857 = vmatpush.msra.mxu2 %v835_v63 }
 0xf4a   :  { %v684_v10 = vor.u32 1.1754944e-38, %v683_v7  ;;  %vm682_vm10 = vcmp.eq.f32.partialorder %v681_v8, 8.507059e+37  ;;  %858 = vmatpush.msra.mxu2 %v834_v0  ;;  %v833_v7 = vld [vmem:[%s1433_s7 + $0x18] sm:$0xff]  ;;  %v832_v8 = vld [vmem:[%s1433_s7 + $0x10] sm:$0xff] }
 0xf4b   :  { %880 = vmatpush.msra.mxu3 %v833_v7 }
 0xf4d   :  { %881 = vmatpush.msra.mxu3 %v832_v8 }
 0xf4e   :  { %v1114_v2 = vpop.eup %1113 }
 0xf4f   :  { %v673_v3 = vmul.f32 %v1114_v2, %v671_v1  ;;  %vm678_vm7 = vweird.f32 %v1114_v2 }
 0xf50   :  { %vm679_vm9 = vmor %vm677_vm8, %vm678_vm7 }
 0xf51   :  { %v674_v4 = vsub.f32 1.0, %v673_v3 }
 0xf53   :  { %v675_v5 = vmul.f32 %v1114_v2, %v674_v4 }
 0xf55   :  { %v676_v6 = vadd.f32 %v1114_v2, %v675_v5 }
 0xf57   :  { %v680_v9 = vsel %vm679_vm9, %v1114_v2, %v676_v6 }
 0xf58   :  { %v685_v13 = vsel %vm682_vm10, %v684_v10, %v680_v9 }
 0xf59   :  { %v688_v16 = vmul.f32 %v685_v13, %v640_v52 }
 0xf9e   :  { %v691_v11 = vpop.permute.xlu2 %690 }
 0xf9f   :  { %v693_v14 = vmul.f32 %v691_v11, %v685_v13 }
 0xfa1   :  { %695 = vrot.lane.b32.xlu0 %v693_v14, %s1140_s4  ;;  %v830_v14 = vld [vmem:[%s1433_s7] sm:$0xff] }
0x1013   :  { %v696_v19 = vpop.permute.xlu0 %695 }
0x1014   :  { %v1365_v20 = vadd.f32 %v696_v19, %v688_v16  ;;  %v1058_v19 = vld [vmem:[%s1434_s9] ss:$0 sm:$0xff] }
0x1016   :  { %1115 = vtanh.f32 %v1365_v20 }
0x1017   :  { %1117 = vtanh.f32 %v796_v12  ;;  %v1142_v12 = vmov 8.0  }
0x101c   :  { %v1116_v21 = vpop.eup %1115 }
0x101d   :  { %701 = vrot.lane.b32.xlu1 %v1116_v21, %s1139_s2  ;;  %v1118_v17 = vpop.eup %1117 }
0x108f   :  { %v702_v23 = vpop.permute.xlu1 %701 }
0x1090   :  { %v704_v15 = vmul.f32 %v702_v23, %v685_v13  ;;  %v831_v13 = vld [vmem:[%s1433_s7 + $0x8] sm:$0xff] }
0x1091   :  { %882 = vmatpush.msra.mxu3 %v831_v13 }
0x1092   :  { %v705_v18 = vpack.c.bf16 %v704_v15, %v704_v15 }
0x1093   :  { %883 = vmatpush.msra.mxu3 %v830_v14 }
0x1094   :  { %707 = vrot.lane.b32.xlu2 %v705_v18, %s1140_s4 }
0x109c   :  { %820 = vrot.lane.b32.xlu2 %v1118_v17, %s1139_s2 }
0x10ee   :  { %v708_v24 = vpop.permute.xlu2 %707 }
0x10ef   :  { %1019 = vmatmul.msk.bf16.vlgmr.msrb.gmra.mxu3 %vm245_vm3, %v708_v24 }
0x10f6   :  { %v821_v52 = vpop.permute.xlu2 %820 }
0x1172   :  { %v721_v26 = vpop.f32.mrf.mxu3 }
0x1173   :  { %v725_v27 = vadd.f32 %v721_v26, %v285_v25 }
0x1175   :  { %1119 = vtanh.f32 %v725_v27  ;;  %v1020_v33 = vmul.f32 -1.442695, %v725_v27 }
0x1176   :  { %1121 = vpow2.f32 %v1030_v31 }
0x1177   :  { %1123 = vpow2.f32 %v1020_v33 }
0x117a   :  { %v723_v28 = vpop.f32.mrf.mxu3 }
0x117b   :  { %v1120_v29 = vpop.eup %1119 }
0x117c   :  { %748 = vrot.lane.b32.xlu0 %v1120_v29, %s1139_s2  ;;  %v1122_v34 = vpop.eup %1121 }
0x117d   :  { %v1124_v35 = vpop.eup %1123  ;;  %v802_v36 = vadd.f32 1.0, %v1122_v34 }
0x117e   :  { %v729_v37 = vadd.f32 1.0, %v1124_v35 }
0x117f   :  { %1125 = vrcp.f32 %v802_v36  ;;  %v814_v45 = vand.u32 2147483648, %v802_v36  ;;  %vm808_vm13 = vweird.f32 %v802_v36  ;;  %v812_v47 = vand.u32 2147483647, %v802_v36 }
0x1180   :  { %1127 = vrcp.f32 %v729_v37  ;;  %v741_v48 = vand.u32 2147483648, %v729_v37  ;;  %vm735_vm15 = vweird.f32 %v729_v37  ;;  %v739_v49 = vand.u32 2147483647, %v729_v37 }
0x1181   :  { %v815_v51 = vor.u32 1.1754944e-38, %v814_v45  ;;  %vm813_vm1 = vcmp.eq.f32.partialorder %v812_v47, 8.507059e+37 }
0x1182   :  { %v742_v54 = vor.u32 1.1754944e-38, %v741_v48  ;;  %vm740_vm2 = vcmp.eq.f32.partialorder %v739_v49, 8.507059e+37 }
0x1185   :  { %v1126_v38 = vpop.eup %1125 }
0x1186   :  { %v1128_v39 = vpop.eup %1127  ;;  %v804_v30 = vmul.f32 %v1126_v38, %v802_v36  ;;  %vm809_vm11 = vweird.f32 %v1126_v38 }
0x1187   :  { %v731_v32 = vmul.f32 %v1128_v39, %v729_v37  ;;  %vm736_vm12 = vweird.f32 %v1128_v39  ;;  %vm810_vm14 = vmor %vm808_vm13, %vm809_vm11 }
0x1188   :  { %v805_v40 = vsub.f32 1.0, %v804_v30  ;;  %vm737_vm0 = vmor %vm735_vm15, %vm736_vm12 }
0x1189   :  { %v732_v41 = vsub.f32 1.0, %v731_v32 }
0x118a   :  { %v806_v42 = vmul.f32 %v1126_v38, %v805_v40 }
0x118b   :  { %v733_v43 = vmul.f32 %v1128_v39, %v732_v41 }
0x118c   :  { %v807_v44 = vadd.f32 %v1126_v38, %v806_v42  ;;  %v1059_v42 = vld [vmem:[%s1435_s10] ss:$0 sm:$0xff] }
0x118d   :  { %v734_v46 = vadd.f32 %v1128_v39, %v733_v43 }
0x118e   :  { %v811_v50 = vsel %vm810_vm14, %v1126_v38, %v807_v44  ;;  %v1060_v44 = vld [vmem:[%s1436_s11] ss:$0 sm:$0xff] }
0x118f   :  { %v738_v53 = vsel %vm737_vm0, %v1128_v39, %v734_v46  ;;  %v816_v55 = vsel %vm813_vm1, %v815_v51, %v811_v50 }
0x1190   :  { %v823_v56 = vmul.f32 %v821_v52, %v816_v55  ;;  %v743_v58 = vsel %vm740_vm2, %v742_v54, %v738_v53 }
0x1191   :  { %v746_v1 = vmul.f32 %v743_v58, %v1365_v20 }
0x1192   :  { %1129 = vtanh.f32 %v823_v56 }
0x1198   :  { %v1130_v60 = vpop.eup %1129 }
0x11ee   :  { %v749_v57 = vpop.permute.xlu0 %748 }
0x11ef   :  { %v751_v59 = vmul.f32 %v749_v57, %v743_v58 }
0x11f1   :  { %753 = vrot.lane.b32.xlu1 %v751_v59, %s1140_s4 }
0x11f9   :  { %826 = vrot.lane.b32.xlu1 %v1130_v60, %s1141_s6 }
0x1263   :  { %v754_v2 = vpop.permute.xlu1 %753 }
0x1264   :  { %v756_v3 = vadd.f32 %v754_v2, %v746_v1 }
0x1266   :  { %1131 = vtanh.f32 %v756_v3 }
0x1267   :  { %1133 = vrcp.f32 %v1142_v12 }
0x126b   :  { %v827_v4 = vpop.permute.xlu1 %826 }
0x126c   :  { %v1132_v5 = vpop.eup %1131  ;;  %v829_v6 = vmul.f32 %v827_v4, %v816_v55 }
0x126d   :  { %759 = vrot.lane.b32.xlu0 %v1132_v5, %s1139_s2  ;;  %v1134_v18 = vpop.eup %1133 }
0x126e   :  { %839 = vrot.lane.b32.xlu2 %v829_v6, %s1140_s4  ;;  %v898_v17 = vmul.f32 8.0, %v1134_v18 }
0x1270   :  { %v899_v24 = vsub.f32 1.0, %v898_v17 }
0x1272   :  { %v900_v25 = vmul.f32 %v1134_v18, %v899_v24 }
0x1274   :  { %v901_v26 = vadd.f32 %v1134_v18, %v900_v25 }
0x12c8   :  { %v840_v9 = vpop.permute.xlu2 %839 }
0x12c9   :  { %1031 = vmatmul.msk.f32.vlgmr.msra.gmra.mxu2 %vm245_vm3, %v840_v9 }
0x12df   :  { %v760_v10 = vpop.permute.xlu0 %759 }
0x12e0   :  { %v762_v11 = vmul.f32 %v760_v10, %v743_v58 }
0x12e2   :  { %864 = vrot.lane.b32.xlu0 %v762_v11, %s1140_s4 }
0x134c   :  { %v860_v20 = vpop.f32.mrf.mxu2 }
0x1354   :  { %v865_v16 = vpop.permute.xlu0 %864 }
0x1355   :  { %1032 = vmatmul.msk.f32.vlgmr.msra.gmra.mxu3 %vm245_vm3, %v865_v16  ;;  %vm902_vm3 = vweird.f32 %v1134_v18 }
0x1356   :  { %v903_v27 = vsel %vm902_vm3, %v1134_v18, %v901_v26 }
0x13d8   :  { %v885_v21 = vpop.f32.mrf.mxu3 }
0x13d9   :  { %v886_v22 = vadd.f32 %v885_v21, %v860_v20 }
0x13db   :  { %v892_v23 = vadd.f32 %v1058_v19, %v886_v22 }
0x13dd   :  { %v894_v15 = vsel %vm893_vm4, %v892_v23, 0.0 }
0x13de   :  { %895 = vadd.xlane.f32.xlu1 %v894_v15 }
0x1451   :  { %v896_v28 = vpop.xlane.xlu1 %895 }
0x1452   :  { %v904_v29 = vmul.f32 %v903_v27, %v896_v28 }
0x1454   :  { %v905_v31 = vsub.f32 %v892_v23, %v904_v29 }
0x1456   :  { %v906_v33 = vmul.f32 %v905_v31, %v905_v31 }
0x1458   :  { %v907_v34 = vsel %vm893_vm4, %v906_v33, 0.0 }
0x1459   :  { %908 = vadd.xlane.f32.xlu2 %v907_v34 }
0x14cc   :  { %v909_v35 = vpop.xlane.xlu2 %908 }
0x14cd   :  { %v910_v36 = vmul.f32 %v909_v35, %v903_v27 }
0x14cf   :  { %v911_v37 = vadd.f32 1e-05, %v910_v36 }
0x14d1   :  { %1135 = vrsqrt.f32 %v911_v37  ;;  %vm918_vm6 = vweird.f32 %v911_v37 }
0x14d7   :  { %v1136_v38 = vpop.eup %1135 }
0x14d8   :  { %v913_v39 = vmul.f32 %v1136_v38, %v911_v37  ;;  %vm919_vm5 = vweird.f32 %v1136_v38 }
0x14d9   :  { %vm920_vm7 = vmor %vm918_vm6, %vm919_vm5 }
0x14da   :  { %v914_v30 = vmul.f32 %v1136_v38, %v913_v39 }
0x14dc   :  { %v915_v32 = vmul.f32 0.5, %v914_v30 }
0x14de   :  { %v916_v40 = vsub.f32 1.5, %v915_v32 }
0x14e0   :  { %v917_v41 = vmul.f32 %v1136_v38, %v916_v40 }
0x14e2   :  { %v921_v43 = vsel %vm920_vm7, %v1136_v38, %v917_v41 }
0x14e3   :  { %v922_v45 = vmul.f32 %v921_v43, %v905_v31 }
0x14e5   :  { %v927_v46 = vmul.f32 %v1059_v42, %v922_v45 }
0x14e7   :  { %v932_v47 = vadd.f32 %v1060_v44, %v927_v46 }
0x14e9   :  { %933 = vst.msk [vmem:[%s1437_s12] sm:$0xff] %vm893_vm4, %v932_v47 }

</bundles_post_ra>
